<compile_context>
chip_gen: v7x
topology: tpu7x:2x2x1
jax: 0.10.0
libtpu: 0.0.40
codegen_flags: <defaults>
</compile_context>

<pallas_src>
import functools

import jax
import jax.numpy as jnp
from jax.experimental import pallas as pl
from jax.experimental.pallas import tpu as pltpu


# ---------------------------------------------------------------------------
# Pallas kernel: per grid step (= one image) compute
#   out_flat = bias_rows + sum_kw  (LHS_kw @ x2) @ FT_kw
# where x2 is (C*H, W), LHS_kw is (C_out*H_out, C*H), FT_kw is (W, W_out).
# ---------------------------------------------------------------------------
def _make_deconv_kernel(k_taps):
    def kernel(x_ref, ft_ref, lhs_ref, b_ref, o_ref):
        x2 = x_ref[0].astype(jnp.bfloat16)                    # (C*H, W) cast in VMEM
        acc = None
        for kw in range(k_taps):                              # static, unrolled (K=3)
            # H-direction upsample + pad + kh taps + channel mix (dominant GEMM,
            # narrow W on the output side -> fewer MXU column tiles).
            t = jnp.dot(lhs_ref[kw], x2,
                        preferred_element_type=jnp.float32)    # (C_out*H_out, W) f32
            # W-direction upsample + pad + kw tap.
            term = jnp.dot(t.astype(jnp.bfloat16), ft_ref[kw],
                           preferred_element_type=jnp.float32)  # (C_out*H_out, W_out)
            acc = term if acc is None else acc + term
        # Fused bias epilogue, single f32 -> output-dtype store.
        o_ref[0] = (acc + b_ref[...]).astype(o_ref.dtype)
    return kernel


# ---------------------------------------------------------------------------
# Host-side glue: interpolation matrices and the pre-composed operands.
# ---------------------------------------------------------------------------
def _interp_matrix(n_in, n_out):
    """Bilinear (align_corners=True) interpolation matrix A: (n_out, n_in)."""
    assert n_in >= 2 and n_out >= 2, "degenerate interpolation size"
    u = jnp.arange(n_out, dtype=jnp.float32)
    src = u * (n_in - 1) / (n_out - 1)
    i0 = jnp.clip(jnp.floor(src).astype(jnp.int32), 0, n_in - 2)
    i1 = i0 + 1
    frac = src - i0.astype(jnp.float32)
    rows = jnp.arange(n_out)
    A = jnp.zeros((n_out, n_in), jnp.float32)
    A = A.at[rows, i0].add(1.0 - frac)
    A = A.at[rows, i1].add(frac)
    return A


def deconv_forward(x, weight, bias, padding=0):
    """bilinear x2 upsample (align_corners=True) + Conv2d(K, stride=1, padding)."""
    N, C, H, W = x.shape
    C_out, C_in, K, K2 = weight.shape
    assert C == C_in and K == K2
    H_up, W_up = 2 * H, 2 * W
    Hp, Wp = H_up + 2 * padding, W_up + 2 * padding
    H_out, W_out = Hp - K + 1, Wp - K + 1
    R, CH = C_out * H_out, C * H

    # Interp matrices with the conv zero-padding folded in as zero rows.
    Ahp = jnp.pad(_interp_matrix(H, H_up), ((padding, padding), (0, 0)))  # (Hp, H)
    Awp = jnp.pad(_interp_matrix(W, W_up), ((padding, padding), (0, 0)))  # (Wp, W)

    # FT_kw[w, j] = Awp[j + kw, w]  (W-upsample + pad + kw tap), stacked transposed.
    FT = jnp.stack([Awp[kw:kw + W_out, :].T for kw in range(K)], axis=0)   # (K, W, W_out)
    # G_kh[i, h] = Ahp[i + kh, h]   (H-upsample + pad + kh tap).
    G = jnp.stack([Ahp[kh:kh + H_out, :] for kh in range(K)], axis=0)      # (K, H_out, H)
    # LHS_kw[(o,i), (c,h)] = sum_kh weight[o,c,kh,kw] * G[kh, i, h]
    LHS = jnp.einsum('ocab,aih->boich', weight, G).reshape(K, R, CH)       # (K, R, CH)

    # bf16 MXU constants (f32 accumulation inside the kernel); x stays f32 and is
    # cast in VMEM by the kernel (saves an HBM pass vs. a host-side cast).
    FT = FT.astype(jnp.bfloat16)
    LHS = LHS.astype(jnp.bfloat16)
    bias_rows = jnp.repeat(bias.astype(jnp.float32), H_out).reshape(R, 1)
    x2 = x.reshape(N, CH, W)                                  # metadata-only reshape

    flops = 2 * N * K * (R * CH * W + R * W * W_out)
    bytes_accessed = (x2.size * x2.dtype.itemsize + FT.size * 2 + LHS.size * 2
                      + bias_rows.size * 4 + N * R * W_out * 4)

    out_flat = pl.pallas_call(
        _make_deconv_kernel(K),
        out_shape=jax.ShapeDtypeStruct((N, R, W_out), jnp.float32),
        grid=(N,),
        in_specs=[
            pl.BlockSpec((1, CH, W), lambda n: (n, 0, 0)),        # per-image input
            pl.BlockSpec((K, W, W_out), lambda n: (0, 0, 0)),     # resident constants
            pl.BlockSpec((K, R, CH), lambda n: (0, 0, 0)),
            pl.BlockSpec((R, 1), lambda n: (0, 0)),
        ],
        out_specs=pl.BlockSpec((1, R, W_out), lambda n: (n, 0, 0)),
        compiler_params=pltpu.CompilerParams(
            dimension_semantics=("parallel",),        # batch axis -> both TCs on v7x
            vmem_limit_bytes=32 * 1024 * 1024,        # fits the v7x 64 MiB budget
        ),
        cost_estimate=pl.CostEstimate(flops=flops, transcendentals=0,
                                      bytes_accessed=bytes_accessed),
    )(x2, FT, LHS, bias_rows)

    # Free (metadata-only) reshape back to NCHW -- no transpose, no extra HBM pass.
    return out_flat.reshape(N, C_out, H_out, W_out)


# ---------------------------------------------------------------------------
# Pure-JAX f32 reference (no Pallas) for correctness checking.
# ---------------------------------------------------------------------------
def _reference_forward(x, weight, bias, padding):
    N, C, H, W = x.shape
    A_h = _interp_matrix(H, 2 * H)
    A_w = _interp_matrix(W, 2 * W)
    up = jnp.einsum('uh,nchw->ncuw', A_h, x)
    up = jnp.einsum('ncuw,vw->ncuv', up, A_w)
    out = jax.lax.conv_general_dilated(
        up, weight, window_strides=(1, 1),
        padding=[(padding, padding), (padding, padding)],
        dimension_numbers=('NCHW', 'OIHW', 'NCHW'))
    return out + bias[None, :, None, None]


# ---------------------------------------------------------------------------
if __name__ == "__main__":
    key = jax.random.PRNGKey(0)
    N, C_in, H, W = 2, 4, 16, 16
    C_out, K, padding = 8, 3, 1

    kx, kwt, kb = jax.random.split(key, 3)
    x = jax.random.normal(kx, (N, C_in, H, W), dtype=jnp.float32)
    fan_in = C_in * K * K
    bound = 1.0 / (fan_in ** 0.5)
    weight = jax.random.uniform(kwt, (C_out, C_in, K, K), jnp.float32, -bound, bound)
    bias = jax.random.uniform(kb, (C_out,), jnp.float32, -bound, bound)

    fwd = jax.jit(functools.partial(deconv_forward, padding=padding))
    out = jax.block_until_ready(fwd(x, weight, bias))

    ref = _reference_forward(x, weight, bias, padding)
    assert out.shape == ref.shape == (N, C_out, 2 * H + 2 * padding - K + 1,
                                      2 * W + 2 * padding - K + 1)
    # bf16 MXU inputs with f32 accumulation -> loosened tolerance vs f32 reference.
    assert jnp.allclose(out, ref, rtol=5e-2, atol=5e-2)

    print("KERNEL_OK")
</pallas_src>

<mosaic_0001>
module attributes {stable_mosaic.version = 11 : i64} {
  func.func private @main(%arg0: i32) attributes {dimension_semantics = [#tpu.dimension_semantics<core_parallel>], iteration_bounds = array<i64: 2>, tpu.core_type = #tpu.core_type<sc_scalar_subcore>, window_params = []} {
    return
  }
}

module attributes {stable_mosaic.version = 11 : i64} {
  func.func private @main(%arg0: i32) attributes {dimension_semantics = [#tpu.dimension_semantics<core_parallel>], iteration_bounds = array<i64: 2>, tpu.core_type = #tpu.core_type<sc_scalar_subcore>, window_params = []} {
    return
  }
}

module attributes {stable_mosaic.version = 11 : i64} {
  func.func @kernel(%arg0: i32, %arg1: memref<1x64x16xf32, #tpu.memory_space<vmem>>, %arg2: memref<3x16x32xbf16, #tpu.memory_space<vmem>>, %arg3: memref<3x256x64xbf16, #tpu.memory_space<vmem>>, %arg4: memref<256x1xf32, #tpu.memory_space<vmem>>, %arg5: memref<1x256x32xf32, #tpu.memory_space<vmem>>) attributes {dimension_semantics = [#tpu.dimension_semantics<parallel>], iteration_bounds = array<i64: 2>, scalar_prefetch = 0 : i64, scratch_operands = 0 : i64, tpu.core_type = #tpu.core_type<tc>, window_params = [{transform_indices = @transform_0, window_bounds = array<i64: 1, 64, 16>}, {pipeline_mode = #tpu.pipeline_mode<synchronous>, transform_indices = @transform_1, window_bounds = array<i64: 3, 16, 32>}, {pipeline_mode = #tpu.pipeline_mode<synchronous>, transform_indices = @transform_2, window_bounds = array<i64: 3, 256, 64>}, {pipeline_mode = #tpu.pipeline_mode<synchronous>, transform_indices = @transform_3, window_bounds = array<i64: 256, 1>}, {transform_indices = @transform_4, window_bounds = array<i64: 1, 256, 32>}]} {
    %c0 = arith.constant 0 : index
    %c0_0 = arith.constant 0 : index
    %c0_1 = arith.constant 0 : index
    %0 = vector.load %arg1[%c0, %c0_0, %c0_1] : memref<1x64x16xf32, #tpu.memory_space<vmem>>, vector<1x64x16xf32>
    %1 = vector.shape_cast %0 : vector<1x64x16xf32> to vector<64x16xf32>
    %2 = arith.truncf %1 : vector<64x16xf32> to vector<64x16xbf16>
    %c0_2 = arith.constant 0 : index
    %c0_3 = arith.constant 0 : index
    %c0_4 = arith.constant 0 : index
    %3 = vector.load %arg3[%c0_2, %c0_3, %c0_4] : memref<3x256x64xbf16, #tpu.memory_space<vmem>>, vector<1x256x64xbf16>
    %4 = vector.shape_cast %3 : vector<1x256x64xbf16> to vector<256x64xbf16>
    %cst = arith.constant dense<0.000000e+00> : vector<256x16xf32>
    %5 = tpu.matmul %4, %2, %cst {dimension_numbers = #tpu.dot_dimension_numbers<[1], [0], [0], [1], [0, 0, 1, 1], [], []>} : vector<256x64xbf16>, vector<64x16xbf16>, vector<256x16xf32> -> vector<256x16xf32>
    %6 = arith.truncf %5 : vector<256x16xf32> to vector<256x16xbf16>
    %c0_5 = arith.constant 0 : index
    %c0_6 = arith.constant 0 : index
    %c0_7 = arith.constant 0 : index
    %7 = vector.load %arg2[%c0_5, %c0_6, %c0_7] : memref<3x16x32xbf16, #tpu.memory_space<vmem>>, vector<1x16x32xbf16>
    %8 = vector.shape_cast %7 : vector<1x16x32xbf16> to vector<16x32xbf16>
    %cst_8 = arith.constant dense<0.000000e+00> : vector<256x32xf32>
    %9 = tpu.matmul %6, %8, %cst_8 {dimension_numbers = #tpu.dot_dimension_numbers<[1], [0], [0], [1], [0, 0, 1, 1], [], []>} : vector<256x16xbf16>, vector<16x32xbf16>, vector<256x32xf32> -> vector<256x32xf32>
    %c1 = arith.constant 1 : index
    %c0_9 = arith.constant 0 : index
    %c0_10 = arith.constant 0 : index
    %10 = vector.load %arg3[%c1, %c0_9, %c0_10] : memref<3x256x64xbf16, #tpu.memory_space<vmem>>, vector<1x256x64xbf16>
    %11 = vector.shape_cast %10 : vector<1x256x64xbf16> to vector<256x64xbf16>
    %cst_11 = arith.constant dense<0.000000e+00> : vector<256x16xf32>
    %12 = tpu.matmul %11, %2, %cst_11 {dimension_numbers = #tpu.dot_dimension_numbers<[1], [0], [0], [1], [0, 0, 1, 1], [], []>} : vector<256x64xbf16>, vector<64x16xbf16>, vector<256x16xf32> -> vector<256x16xf32>
    %13 = arith.truncf %12 : vector<256x16xf32> to vector<256x16xbf16>
    %c1_12 = arith.constant 1 : index
    %c0_13 = arith.constant 0 : index
    %c0_14 = arith.constant 0 : index
    %14 = vector.load %arg2[%c1_12, %c0_13, %c0_14] : memref<3x16x32xbf16, #tpu.memory_space<vmem>>, vector<1x16x32xbf16>
    %15 = vector.shape_cast %14 : vector<1x16x32xbf16> to vector<16x32xbf16>
    %cst_15 = arith.constant dense<0.000000e+00> : vector<256x32xf32>
    %16 = tpu.matmul %13, %15, %cst_15 {dimension_numbers = #tpu.dot_dimension_numbers<[1], [0], [0], [1], [0, 0, 1, 1], [], []>} : vector<256x16xbf16>, vector<16x32xbf16>, vector<256x32xf32> -> vector<256x32xf32>
    %17 = arith.addf %9, %16 : vector<256x32xf32>
    %c2 = arith.constant 2 : index
    %c0_16 = arith.constant 0 : index
    %c0_17 = arith.constant 0 : index
    %18 = vector.load %arg3[%c2, %c0_16, %c0_17] : memref<3x256x64xbf16, #tpu.memory_space<vmem>>, vector<1x256x64xbf16>
    %19 = vector.shape_cast %18 : vector<1x256x64xbf16> to vector<256x64xbf16>
    %cst_18 = arith.constant dense<0.000000e+00> : vector<256x16xf32>
    %20 = tpu.matmul %19, %2, %cst_18 {dimension_numbers = #tpu.dot_dimension_numbers<[1], [0], [0], [1], [0, 0, 1, 1], [], []>} : vector<256x64xbf16>, vector<64x16xbf16>, vector<256x16xf32> -> vector<256x16xf32>
    %21 = arith.truncf %20 : vector<256x16xf32> to vector<256x16xbf16>
    %c2_19 = arith.constant 2 : index
    %c0_20 = arith.constant 0 : index
    %c0_21 = arith.constant 0 : index
    %22 = vector.load %arg2[%c2_19, %c0_20, %c0_21] : memref<3x16x32xbf16, #tpu.memory_space<vmem>>, vector<1x16x32xbf16>
    %23 = vector.shape_cast %22 : vector<1x16x32xbf16> to vector<16x32xbf16>
    %cst_22 = arith.constant dense<0.000000e+00> : vector<256x32xf32>
    %24 = tpu.matmul %21, %23, %cst_22 {dimension_numbers = #tpu.dot_dimension_numbers<[1], [0], [0], [1], [0, 0, 1, 1], [], []>} : vector<256x16xbf16>, vector<16x32xbf16>, vector<256x32xf32> -> vector<256x32xf32>
    %25 = arith.addf %17, %24 : vector<256x32xf32>
    %c0_23 = arith.constant 0 : index
    %c0_24 = arith.constant 0 : index
    %26 = vector.load %arg4[%c0_23, %c0_24] : memref<256x1xf32, #tpu.memory_space<vmem>>, vector<256x1xf32>
    %27 = vector.broadcast %26 : vector<256x1xf32> to vector<256x32xf32>
    %28 = arith.addf %25, %27 : vector<256x32xf32>
    %c0_25 = arith.constant 0 : index
    %c0_26 = arith.constant 0 : index
    %c0_27 = arith.constant 0 : index
    %29 = vector.load %arg5[%c0_25, %c0_26, %c0_27] : memref<1x256x32xf32, #tpu.memory_space<vmem>>, vector<1x256x32xf32>
    %30 = vector.shape_cast %29 : vector<1x256x32xf32> to vector<256x32xf32>
    %31 = vector.shape_cast %28 : vector<256x32xf32> to vector<1x256x32xf32>
    tpu.vector_store %arg5[%c0_25, %c0_26, %c0_27], %31 {strides = array<i32>} : memref<1x256x32xf32, #tpu.memory_space<vmem>>, vector<1x256x32xf32>,
    return
  }
  func.func @transform_0(%arg0: i32) -> (i32, i32, i32) {
    %c0_i32 = arith.constant 0 : i32
    %c0_i32_0 = arith.constant 0 : i32
    %c0_i32_1 = arith.constant 0 : i32
    return %arg0, %c0_i32, %c0_i32_0 : i32, i32, i32
  }
  func.func @transform_1(%arg0: i32) -> (i32, i32, i32) {
    %c0_i32 = arith.constant 0 : i32
    %c0_i32_0 = arith.constant 0 : i32
    %c0_i32_1 = arith.constant 0 : i32
    %c0_i32_2 = arith.constant 0 : i32
    return %c0_i32, %c0_i32_0, %c0_i32_1 : i32, i32, i32
  }
  func.func @transform_2(%arg0: i32) -> (i32, i32, i32) {
    %c0_i32 = arith.constant 0 : i32
    %c0_i32_0 = arith.constant 0 : i32
    %c0_i32_1 = arith.constant 0 : i32
    %c0_i32_2 = arith.constant 0 : i32
    return %c0_i32, %c0_i32_0, %c0_i32_1 : i32, i32, i32
  }
  func.func @transform_3(%arg0: i32) -> (i32, i32) {
    %c0_i32 = arith.constant 0 : i32
    %c0_i32_0 = arith.constant 0 : i32
    %c0_i32_1 = arith.constant 0 : i32
    return %c0_i32, %c0_i32_0 : i32, i32
  }
  func.func @transform_4(%arg0: i32) -> (i32, i32, i32) {
    %c0_i32 = arith.constant 0 : i32
    %c0_i32_0 = arith.constant 0 : i32
    %c0_i32_1 = arith.constant 0 : i32
    return %arg0, %c0_i32, %c0_i32_0 : i32, i32, i32
  }
}

</mosaic_0001>

<bundles_post_ra>
// kernel: deconv_forward.1
= control target key start
LH: loop header
LB: loop body
LE: loop exit
PB: predicated region body
PF: predicated region fallthrough
CT: control target
= control target key end

     0   :  { %9 = vsyncpa [#allocation3], 0  ;;  %s3774_s0 = inlined_call_operand.vmem [shape: f32[2,64,16], index: 0, kind: input, shape index: {}]   ;;  %s3775_s1 = inlined_call_operand.vmem [shape: bf16[3,16,32], index: 1, kind: input, shape index: {}]   ;;  %s3776_s2 = inlined_call_operand.vmem [shape: bf16[3,256,64], index: 2, kind: input, shape index: {}]   ;;  %s3777_s3 = inlined_call_operand.vmem [shape: f32[256,1], index: 3, kind: input, shape index: {}]   ;;  %s3778_s4 = inlined_call_operand.hbm [shape: f32[2,256,32], index: 4, kind: output, shape index: {}]  }
   0x1   :  { %11 = vsyncpa [#allocation3 + $0x1], 0  ;;  %s3056_s15 = smov 0   ;;  %s3058_s16 = smov 0  }
   0x2   :  { %s3060_s17 = smov 0   ;;  %s3062_s18 = smov 0  }
   0x3 LB: > { %s3077_s19 = sadd.s32 4294967295, %s3025_s18   ;;  %s2242_s20 = sadd.s32 4294967294, %s3025_s18   ;;  %s3025_s18 = sphi %s3062_s18, %s3784_s18   ;;  %s3021_s17 = sphi %s3060_s17, %s3783_s17   ;;  %s3017_s16 = sphi %s3058_s16, %s3782_s16   ;;  %s3013_s15 = sphi %s3056_s15, %s3781_s15  }
   0x4   : > { %s3081_s21 = sadd.s32 1, %s3025_s18   ;;  %s113_s22 = sadd.s32 1, %s3021_s17 }
   0x5   : > { %s110_s23 = ssub.s32 %s3025_s18, %s3081_s21  ;;  %p123_p0 = scmp.ne.s32.totalorder %s3021_s17, %s3017_s16 }
   0x6   : > { %p111_p1 = scmp.eq.s32.totalorder %s110_s23, 0  ;;  %p124_p2 = scmp.eq.s32.totalorder %s3077_s19, 1 }
   0x7   : > { %p129_p3 = scmp.ne.s32.totalorder %s3017_s16, %s3013_s15  ;;  %p130_p4 = scmp.eq.s32.totalorder %s2242_s20, 1 }
   0x8   : > { %s3092_s24 = scalar_select %p111_p1, %s3021_s17, %s113_s22  }
   0x9   : > { %p3094_p5 = por %p124_p2, %p123_p0  ;;  %p3098_p6 = por %p130_p4, %p129_p3 }
   0xa   : > { %p2245_p7 = scmp.ge.s32.totalorder %s3025_s18, 1  ;;  %p165_p8 = scmp.lt.s32.totalorder %s3025_s18, 3 }
   0xc   : > { %p166_p9 = pnand %p2245_p7, %p165_p8 }
   0xd   : > { %p191_p10 = scmp.lt.s32.totalorder (!%p166_p9), %s3077_s19, 1  ;;  %v2912_v0 = vld [vmem:[%s3776_s2] sm:$0xff] (!%p166_p9)   ;;  %vm321_vm0 = vcmask (!%p166_p9), 523264   ;;  %v2913_v13 = vld [vmem:[%s3776_s2 + $0x8] sm:$0xff] (!%p166_p9)   ;;  %v2914_v14 = vld [vmem:[%s3776_s2 + $0x10] sm:$0xff] (!%p166_p9)   ;;  %vm896_vm1 = vcmask (!%p166_p9), 130048  }
   0xe   : > { %169 = sbr.rel (%p166_p9) target bundleno = 742 (0x2e6), region = 36  ;;  %2590 = vmatprep.mubr.msk.bf16.mxu1 (!%p166_p9), %vm321_vm0, %v2912_v0  ;;  %v2915_v15 = vld [vmem:[%s3776_s2 + $0x18] sm:$0xff] (!%p166_p9)   ;;  %v2916_v16 = vld [vmem:[%s3776_s2 + $0x20] sm:$0xff] (!%p166_p9)   ;;  %v2917_v17 = vld [vmem:[%s3776_s2 + $0x28] sm:$0xff] (!%p166_p9)   ;;  %s188_s28 = sand.u32 (!%p166_p9), 1, %s3017_s16   ;;  %vm2133_vm2 = vcmask (!%p166_p9), 261120  }
   0xf   : > { %v2918_v18 = vld [vmem:[%s3776_s2 + $0x30] sm:$0xff] (!%p166_p9)   ;;  %v2919_v19 = vld [vmem:[%s3776_s2 + $0x38] sm:$0xff] (!%p166_p9)   ;;  %v2920_v20 = vld [vmem:[%s3776_s2 + $0x40] sm:$0xff] (!%p166_p9)   ;;  %s2470_s5 = sshll.u32 (!%p166_p9), %s3077_s19, 12  ;;  %s3028_s11 = smov (!%p166_p9), [#allocation2]  }
  0x10   : > { %v2921_v21 = vld [vmem:[%s3776_s2 + $0x48] sm:$0xff] (!%p166_p9)   ;;  %v2922_v22 = vld [vmem:[%s3776_s2 + $0x50] sm:$0xff] (!%p166_p9)   ;;  %v2923_v23 = vld [vmem:[%s3776_s2 + $0x58] sm:$0xff] (!%p166_p9)   ;;  %s3721_s9 = scalar_lea.hbm (!%p166_p9), %s3778_s4, %s2470_s5  ;;  %s2967_s12 = sshll.u32 (!%p166_p9), %s3028_s11, 4  ;;  %s2968_s12 = int_to_ptr.vmem [resolvable:$false] %s2967_s12 }
  0x11   : > { %v2924_v24 = vld [vmem:[%s3776_s2 + $0x60] sm:$0xff] (!%p166_p9)   ;;  %v2925_v25 = vld [vmem:[%s3776_s2 + $0x68] sm:$0xff] (!%p166_p9)   ;;  %v2926_v26 = vld [vmem:[%s3776_s2 + $0x70] sm:$0xff] (!%p166_p9)   ;;  %s2969_s13 = scalar_lea.vmem (!%p166_p9), %s2968_s12, 8192 }
  0x12   : > { %v2927_v27 = vld [vmem:[%s3776_s2 + $0x78] sm:$0xff] (!%p166_p9)   ;;  %v2928_v28 = vld [vmem:[%s3776_s2 + $0x80] sm:$0xff] (!%p166_p9)   ;;  %v2929_v29 = vld [vmem:[%s3776_s2 + $0x88] sm:$0xff] (!%p166_p9)  }
  0x13   : > { %v2930_v30 = vld [vmem:[%s3776_s2 + $0x90] sm:$0xff] (!%p166_p9)   ;;  %v2931_v31 = vld [vmem:[%s3776_s2 + $0x98] sm:$0xff] (!%p166_p9)   ;;  %v2932_v32 = vld [vmem:[%s3776_s2 + $0xa0] sm:$0xff] (!%p166_p9)  }
  0x14   : > { %v2933_v33 = vld [vmem:[%s3776_s2 + $0xa8] sm:$0xff] (!%p166_p9)   ;;  %v2934_v34 = vld [vmem:[%s3776_s2 + $0xb0] sm:$0xff] (!%p166_p9)   ;;  %v2935_v35 = vld [vmem:[%s3776_s2 + $0xb8] sm:$0xff] (!%p166_p9)  }
  0x15   : > { %s192_s29 = scalar_select %p191_p10, %s3077_s19, 1  ;;  %v2936_v36 = vld [vmem:[%s3776_s2 + $0xc0] sm:$0xff]   ;;  %v2937_v37 = vld [vmem:[%s3776_s2 + $0xc8] sm:$0xff]   ;;  %v2938_v38 = vld [vmem:[%s3776_s2 + $0xd0] sm:$0xff]  }
  0x16   : > { %v2939_v39 = vld [vmem:[%s3776_s2 + $0xd8] sm:$0xff]   ;;  %v2940_v40 = vld [vmem:[%s3776_s2 + $0xe0] sm:$0xff]   ;;  %v2941_v41 = vld [vmem:[%s3776_s2 + $0xe8] sm:$0xff]   ;;  %s3733_s19 = scalar_lea.sflag [#allocation3], %s188_s28 }
  0x17   : > { %s2469_s30 = sshll.u32 %s192_s29, 6  ;;  %v2942_v42 = vld [vmem:[%s3776_s2 + $0xf0] sm:$0xff]   ;;  %v2943_v43 = vld [vmem:[%s3776_s2 + $0xf8] sm:$0xff]   ;;  %v2944_v44 = vld [vmem:[%s3776_s2 + $0x100] sm:$0xff]   ;;  %s2246_s29 = sshll.u32 %s188_s28, 8 }
  0x18   : > { %s195_s7 = scalar_lea.vmem %s3774_s0, %s2469_s30  ;;  %v2945_v45 = vld [vmem:[%s3776_s2 + $0x108] sm:$0xff]   ;;  %v2946_v46 = vld [vmem:[%s3776_s2 + $0x110] sm:$0xff]   ;;  %v2947_v47 = vld [vmem:[%s3776_s2 + $0x118] sm:$0xff]   ;;  %s3656_s30 = scalar_lea.vmem [#allocation2], %s2246_s29 }
  0x19   : > { %v197_v1 = vld [vmem:[%s195_s7] sm:$0xff]  ;;  %v198_v2 = vld [vmem:[%s195_s7 + $0x8] sm:$0xff]  ;;  %v199_v3 = vld [vmem:[%s195_s7 + $0x10] sm:$0xff]  ;;  %s2180_s6 = sshll.u32 %s3656_s30, 4  ;;  %s3723_s6 = int_to_ptr.vmem [resolvable:$true] %s2180_s6 }
  0x1a   : > { %v205_v4 = vpack.c.bf16 %v198_v2, %v197_v1  ;;  %v200_v5 = vld [vmem:[%s195_s7 + $0x18] sm:$0xff]  ;;  %v201_v7 = vld [vmem:[%s195_s7 + $0x20] sm:$0xff]  ;;  %v202_v8 = vld [vmem:[%s195_s7 + $0x28] sm:$0xff]  ;;  %s2963_s10 = scalar_lea.vmem %s3723_s6, 4096  ;;  %p2970_p0 = scmp.lt.s32.totalorder %s3723_s6, %s2968_s12 }
  0x1b   : > { %v3113_v6 = vpack.c.bf16 %v200_v5, %v199_v3  ;;  %v207_v9 = vpack.c.bf16 %v202_v8, %v201_v7  ;;  %v203_v10 = vld [vmem:[%s195_s7 + $0x30] sm:$0xff]  ;;  %v204_v11 = vld [vmem:[%s195_s7 + $0x38] sm:$0xff]  ;;  %v2948_v48 = vld [vmem:[%s3776_s2 + $0x120] sm:$0xff]   ;;  %p2964_p11 = scmp.ne.s32.totalorder %s3723_s6, %s2963_s10  ;;  %p2971_p1 = scmp.lt.s32.totalorder %s2969_s13, %s2963_s10 }
  0x1c   : > { %2582 = vmatprep.subr.bf16.mxu1 %v205_v4  ;;  %v208_v12 = vpack.c.bf16 %v204_v11, %v203_v10  ;;  %v2949_v49 = vld [vmem:[%s3776_s2 + $0x128] sm:$0xff]   ;;  %v2950_v50 = vld [vmem:[%s3776_s2 + $0x130] sm:$0xff]   ;;  %v2951_v51 = vld [vmem:[%s3776_s2 + $0x138] sm:$0xff]  }
  0x1d   : > { %2583 = vmatpush3.bf16.msra.mxu1 %v205_v4  ;;  %v2960_v52 = vld [vmem:[%s3775_s1 + $0x8] sm:$0xff]   ;;  %v2952_v53 = vld [vmem:[%s3776_s2 + $0x140] sm:$0xff]   ;;  %v2954_v56 = vld [vmem:[%s3776_s2 + $0x150] sm:$0xff]   ;;  %p2965_p12 = pnand %p2964_p11, %p3094_p5  ;;  %p2972_p2 = por %p2971_p1, %p2970_p0 }
  0x1e   : > { %2584 = vmatprep.subr.bf16.mxu1 %v3113_v6  ;;  %2662 = vmatprep.subr.bf16.mxu0 %v2960_v52  ;;  %v3287_v54 = vld [vmem:[%s3775_s1] sm:$0xff]   ;;  %v2953_v55 = vld [vmem:[%s3776_s2 + $0x148] sm:$0xff]   ;;  %v2955_v57 = vld [vmem:[%s3776_s2 + $0x158] sm:$0xff]  }
  0x1f   : > { %2663 = vmatpush3.bf16.msra.mxu0 %v2960_v52  ;;  %v2956_v58 = vld [vmem:[%s3776_s2 + $0x160] sm:$0xff]   ;;  %v2957_v59 = vld [vmem:[%s3776_s2 + $0x168] sm:$0xff]   ;;  %v2958_v60 = vld [vmem:[%s3776_s2 + $0x170] sm:$0xff]   ;;  %p2966_p13 = pneg %p2965_p12 }
  0x20   : > { %2696 = vmatprep.subr.bf16.mxu0 %v3287_v54  ;;  %v2959_v61 = vld [vmem:[%s3776_s2 + $0x178] sm:$0xff]   ;;  %v3417_v52 = vld [vmem:[%s3775_s1 + $0x10] sm:$0xff]  }
  0x21   : > { %2585 = vmatpush3.bf16.msra.mxu1 %v3113_v6  ;;  %p2973_p3 = pnand %p2972_p2, %p2966_p13 }
  0x22   : > { %2586 = vmatprep.subr.bf16.mxu1 %v207_v9 }
  0x25   : > { %2587 = vmatpush3.bf16.msra.mxu1 %v207_v9 }
  0x26   : > { %2588 = vmatprep.subr.bf16.mxu1 %v208_v12 }
  0x29   : > { %2589 = vmatpush3.bf16.msra.mxu1 %v208_v12 }
  0x2a   : > { %2622 = vmatprep.subr.bf16.mxu1 %v205_v4 }
  0x2c   : > { %2591 = vmatmul.mubr.msk.bf16.vlgmr.msra.gmra.mrb[0].mxu1 %vm321_vm0, %v2913_v13 }
  0x2d   : > { %2623 = vmatpush3.bf16.msra.mxu1 %v205_v4  ;;  %2594 = vmatprep.mubr.msk.bf16.mxu1 %vm321_vm0, %v2914_v14 }
  0x2e   : > { %2624 = vmatprep.subr.bf16.mxu1 %v3113_v6 }
  0x31   : > { %2625 = vmatpush3.bf16.msra.mxu1 %v3113_v6 }
  0x32   : > { %2626 = vmatprep.subr.bf16.mxu1 %v207_v9 }
  0x34   : > { %2595 = vmatmul.mubr.msk.bf16.gmra.mrb[4].mxu1 %vm321_vm0, %v2915_v15 }
  0x35   : > { %2598 = vmatprep.mubr.msk.bf16.mxu1 %vm321_vm0, %v2916_v16  ;;  %2627 = vmatpush3.bf16.msra.mxu1 %v207_v9 }
  0x36   : > { %2628 = vmatprep.subr.bf16.mxu1 %v208_v12 }
  0x39   : > { %2629 = vmatpush3.bf16.msra.mxu1 %v208_v12 }
  0x3a   : > { %2730 = vmatprep.subr.bf16.mxu1 %v205_v4 }
  0x3c   : > { %2599 = vmatmul.mubr.msk.bf16.gmra.mrb[8].mxu1 %vm321_vm0, %v2917_v17 }
  0x3d   : > { %2602 = vmatprep.mubr.msk.bf16.mxu1 %vm321_vm0, %v2918_v18 }
  0x44   : > { %2603 = vmatmul.mubr.msk.bf16.gmra.mrb[12].mxu1 %vm321_vm0, %v2919_v19 }
  0x45   : > { %2606 = vmatprep.mubr.msk.bf16.mxu1 %vm321_vm0, %v2920_v20 }
  0x4c   : > { %2607 = vmatmul.mubr.msk.bf16.gmra.mrb[16].mxu1 %vm321_vm0, %v2921_v21 }
  0x4d   : > { %2610 = vmatprep.mubr.msk.bf16.mxu1 %vm321_vm0, %v2922_v22 }
  0x54   : > { %2611 = vmatmul.mubr.msk.bf16.gmra.mrb[20].mxu1 %vm321_vm0, %v2923_v23 }
  0x55   : > { %2614 = vmatprep.mubr.msk.bf16.mxu1 %vm321_vm0, %v2924_v24 }
  0x5c   : > { %2615 = vmatmul.mubr.msk.bf16.gmra.mrb[24].mxu1 %vm321_vm0, %v2925_v25 }
  0x5d   : > { %2618 = vmatprep.mubr.msk.bf16.mxu1 %vm321_vm0, %v2926_v26 }
  0x64   : > { %2619 = vmatmul.mubr.msk.bf16.gmra.mrb[28].mxu1 %vm321_vm0, %v2927_v27 }
  0x65   : > { %2630 = vmatprep.mubr.msk.bf16.mxu1 %vm321_vm0, %v2928_v28 }
  0x6c   : > { %2631 = vmatmul.mubr.msk.bf16.vlgmr.msra.gmra.mrb[32].mxu1 %vm321_vm0, %v2929_v29 }
  0x6d   : > { %2634 = vmatprep.mubr.msk.bf16.mxu1 %vm321_vm0, %v2930_v30  ;;  %2731 = vmatpush3.bf16.msra.mxu1 %v205_v4 }
  0x6e   : > { %2732 = vmatprep.subr.bf16.mxu1 %v3113_v6 }
  0x71   : > { %2733 = vmatpush3.bf16.msra.mxu1 %v3113_v6 }
  0x72   : > { %2734 = vmatprep.subr.bf16.mxu1 %v207_v9 }
  0x74   : > { %2635 = vmatmul.mubr.msk.bf16.gmra.mrb[36].mxu1 %vm321_vm0, %v2931_v31 }
  0x75   : > { %2638 = vmatprep.mubr.msk.bf16.mxu1 %vm321_vm0, %v2932_v32  ;;  %2735 = vmatpush3.bf16.msra.mxu1 %v207_v9 }
  0x76   : > { %2736 = vmatprep.subr.bf16.mxu1 %v208_v12 }
  0x79   : > { %2737 = vmatpush3.bf16.msra.mxu1 %v208_v12 }
  0x7c   : > { %2639 = vmatmul.mubr.msk.bf16.gmra.mrb[40].mxu1 %vm321_vm0, %v2933_v33 }
  0x7d   : > { %2642 = vmatprep.mubr.msk.bf16.mxu1 %vm321_vm0, %v2934_v34 }
  0x84   : > { %2643 = vmatmul.mubr.msk.bf16.gmra.mrb[44].mxu1 %vm321_vm0, %v2935_v35 }
  0x85   : > { %2646 = vmatprep.mubr.msk.bf16.mxu1 %vm321_vm0, %v2936_v36 }
  0x8c   : > { %2647 = vmatmul.mubr.msk.bf16.gmra.mrb[48].mxu1 %vm321_vm0, %v2937_v37 }
  0x8d   : > { %2650 = vmatprep.mubr.msk.bf16.mxu1 %vm321_vm0, %v2938_v38 }
  0x94   : > { %2651 = vmatmul.mubr.msk.bf16.gmra.mrb[52].mxu1 %vm321_vm0, %v2939_v39 }
  0x95   : > { %2654 = vmatprep.mubr.msk.bf16.mxu1 %vm321_vm0, %v2940_v40 }
  0x9c   : > { %2655 = vmatmul.mubr.msk.bf16.gmra.mrb[56].mxu1 %vm321_vm0, %v2941_v41 }
  0x9d   : > { %2658 = vmatprep.mubr.msk.bf16.mxu1 %vm321_vm0, %v2942_v42 }
  0xa4   : > { %2659 = vmatmul.mubr.msk.bf16.gmra.mrb[60].mxu1 %vm321_vm0, %v2943_v43 }
  0xa5   : > { %2738 = vmatprep.mubr.msk.bf16.mxu1 %vm321_vm0, %v2944_v44 }
  0xac   : > { %2739 = vmatmul.mubr.msk.bf16.vlgmr.msra.gmra.mrb[64].mxu1 %vm321_vm0, %v2945_v45 }
  0xad   : > { %2742 = vmatprep.mubr.msk.bf16.mxu1 %vm321_vm0, %v2946_v46 }
  0xb4   : > { %2743 = vmatmul.mubr.msk.bf16.gmra.mrb[68].mxu1 %vm321_vm0, %v2947_v47 }
  0xb5   : > { %2746 = vmatprep.mubr.msk.bf16.mxu1 %vm321_vm0, %v2948_v48 }
  0xbc   : > { %2747 = vmatmul.mubr.msk.bf16.gmra.mrb[72].mxu1 %vm321_vm0, %v2949_v49 }
  0xbd   : > { %2750 = vmatprep.mubr.msk.bf16.mxu1 %vm321_vm0, %v2950_v50 }
  0xc4   : > { %2751 = vmatmul.mubr.msk.bf16.gmra.mrb[76].mxu1 %vm321_vm0, %v2951_v51 }
  0xc5   : > { %2754 = vmatprep.mubr.msk.bf16.mxu1 %vm321_vm0, %v2952_v53 }
  0xcc   : > { %2755 = vmatmul.mubr.msk.bf16.gmra.mrb[80].mxu1 %vm321_vm0, %v2953_v55 }
  0xcd   : > { %2758 = vmatprep.mubr.msk.bf16.mxu1 %vm321_vm0, %v2954_v56 }
  0xd4   : > { %2759 = vmatmul.mubr.msk.bf16.gmra.mrb[84].mxu1 %vm321_vm0, %v2955_v57 }
  0xd5   : > { %2762 = vmatprep.mubr.msk.bf16.mxu1 %vm321_vm0, %v2956_v58 }
  0xdc   : > { %2763 = vmatmul.mubr.msk.bf16.gmra.mrb[88].mxu1 %vm321_vm0, %v2957_v59 }
  0xdd   : > { %2766 = vmatprep.mubr.msk.bf16.mxu1 %vm321_vm0, %v2958_v60 }
  0xe4   : > { %2767 = vmatmul.mubr.msk.bf16.gmra.mrb[92].mxu1 %vm321_vm0, %v2959_v61 }
  0xff   : > { %v3318_v62 = vpop.f32.mrb[0].mxu1 }
 0x100   : > { %v3320_v63 = vpop.f32.mrb[1].mxu1 }
 0x101   : > { %v3322_v0 = vpop.f32.mrb[2].mxu1 }
 0x102   : > { %v532_v1 = vpack.c.bf16 %v3322_v0, %v3318_v62  ;;  %v3326_v2 = vpop.f32.mrb[3].mxu1  ;;  %v1934_v62 = vld [vmem:[%s3777_s3 + $0xc8] sm:$0xff]  ;;  %v1933_v0 = vld [vmem:[%s3777_s3 + $0xc0] sm:$0xff] }
 0x103   : > { %v531_v3 = vpack.c.bf16 %v3326_v2, %v3320_v63 }
 0x107   : > { %v3330_v4 = vpop.f32.mrb[4].mxu1 }
 0x108   : > { %v3332_v5 = vpop.f32.mrb[5].mxu1 }
 0x109   : > { %v3334_v6 = vpop.f32.mrb[6].mxu1 }
 0x10a   : > { %v534_v7 = vpack.c.bf16 %v3334_v6, %v3330_v4  ;;  %v3338_v8 = vpop.f32.mrb[7].mxu1  ;;  %v1937_v4 = vld [vmem:[%s3777_s3 + $0xe0] sm:$0xff] }
 0x10b   : > { %v533_v9 = vpack.c.bf16 %v3338_v8, %v3332_v5 }
 0x10f   : > { %v3342_v10 = vpop.f32.mrb[8].mxu1 }
 0x110   : > { %v3344_v11 = vpop.f32.mrb[9].mxu1 }
 0x111   : > { %v3346_v12 = vpop.f32.mrb[10].mxu1 }
 0x112   : > { %v536_v13 = vpack.c.bf16 %v3346_v12, %v3342_v10  ;;  %v3350_v14 = vpop.f32.mrb[11].mxu1 }
 0x113   : > { %v535_v15 = vpack.c.bf16 %v3350_v14, %v3344_v11  ;;  %v1940_v14 = vld [vmem:[%s3777_s3 + $0xf8] sm:$0xff] }
 0x117   : > { %v3354_v16 = vpop.f32.mrb[12].mxu1 }
 0x118   : > { %v3356_v17 = vpop.f32.mrb[13].mxu1 }
 0x119   : > { %v3358_v18 = vpop.f32.mrb[14].mxu1 }
 0x11a   : > { %v538_v19 = vpack.c.bf16 %v3358_v18, %v3354_v16  ;;  %v3362_v20 = vpop.f32.mrb[15].mxu1 }
 0x11b   : > { %v537_v21 = vpack.c.bf16 %v3362_v20, %v3356_v17 }
 0x11f   : > { %v3366_v22 = vpop.f32.mrb[16].mxu1 }
 0x120   : > { %v3368_v23 = vpop.f32.mrb[17].mxu1 }
 0x121   : > { %v3370_v24 = vpop.f32.mrb[18].mxu1 }
 0x122   : > { %v540_v25 = vpack.c.bf16 %v3370_v24, %v3366_v22  ;;  %v3374_v26 = vpop.f32.mrb[19].mxu1 }
 0x123   : > { %v539_v27 = vpack.c.bf16 %v3374_v26, %v3368_v23 }
 0x127   : > { %v3378_v28 = vpop.f32.mrb[20].mxu1 }
 0x128   : > { %v3380_v29 = vpop.f32.mrb[21].mxu1 }
 0x129   : > { %v3382_v30 = vpop.f32.mrb[22].mxu1 }
 0x12a   : > { %v542_v31 = vpack.c.bf16 %v3382_v30, %v3378_v28  ;;  %v3386_v32 = vpop.f32.mrb[23].mxu1 }
 0x12b   : > { %v541_v33 = vpack.c.bf16 %v3386_v32, %v3380_v29 }
 0x12f   : > { %v3390_v34 = vpop.f32.mrb[24].mxu1 }
 0x130   : > { %v3392_v35 = vpop.f32.mrb[25].mxu1 }
 0x131   : > { %v3394_v36 = vpop.f32.mrb[26].mxu1 }
 0x132   : > { %v544_v37 = vpack.c.bf16 %v3394_v36, %v3390_v34  ;;  %v3398_v38 = vpop.f32.mrb[27].mxu1 }
 0x133   : > { %v543_v39 = vpack.c.bf16 %v3398_v38, %v3392_v35 }
 0x137   : > { %v3402_v40 = vpop.f32.mrb[28].mxu1 }
 0x138   : > { %v3404_v41 = vpop.f32.mrb[29].mxu1 }
 0x139   : > { %v3406_v42 = vpop.f32.mrb[30].mxu1 }
 0x13a   : > { %v546_v43 = vpack.c.bf16 %v3406_v42, %v3402_v40  ;;  %v3410_v44 = vpop.f32.mrb[31].mxu1 }
 0x13b   : > { %v545_v45 = vpack.c.bf16 %v3410_v44, %v3404_v41 }
 0x13f   : > { %v2632_v46 = vpop.f32.mrb[32].mxu1 }
 0x140   : > { %v744_v47 = vpop.f32.mrb[33].mxu1 }
 0x141   : > { %v2633_v48 = vpop.f32.mrb[34].mxu1 }
 0x142   : > { %v872_v49 = vpack.c.bf16 %v2633_v48, %v2632_v46  ;;  %v747_v50 = vpop.f32.mrb[35].mxu1 }
 0x143   : > { %v871_v51 = vpack.c.bf16 %v747_v50, %v744_v47  ;;  %v1911_v50 = vld [vmem:[%s3777_s3 + $0x10] sm:$0xff] }
 0x145   : > { %2664 = vmatprep.mubr.msk.bf16.mxu0 %vm896_vm1, %v871_v51  ;;  %v1909_v51 = vld [vmem:[%s3777_s3] sm:$0xff] }
 0x146   : > { %2665 = vmatmul.mubr.msk.bf16.vlgmr.msra.gmra.mrb[0].mxu0 %vm896_vm1, %v872_v49 }
 0x147   : > { %v2636_v53 = vpop.f32.mrb[36].mxu1  ;;  %2697 = vmatpush3.bf16.msra.mxu0 %v3287_v54 }
 0x148   : > { %v760_v55 = vpop.f32.mrb[37].mxu1  ;;  %2770 = vmatprep.subr.bf16.mxu0 %v3417_v52 }
 0x149   : > { %v2637_v56 = vpop.f32.mrb[38].mxu1 }
 0x14a   : > { %v874_v57 = vpack.c.bf16 %v2637_v56, %v2636_v53  ;;  %v763_v58 = vpop.f32.mrb[39].mxu1 }
 0x14b   : > { %v873_v59 = vpack.c.bf16 %v763_v58, %v760_v55  ;;  %v3027_v55 = vmov 0  }
 0x14c   : > { %2911 = vset.pattern.permute.xlu1 %v3027_v55  ;;  %2910 = vset.pattern.permute.xlu0 %v3027_v55  ;;  %v1916_v55 = vld [vmem:[%s3777_s3 + $0x38] sm:$0xff] }
 0x14d   : > { %2668 = vmatprep.mubr.msk.bf16.mxu0 %vm896_vm1, %v873_v59  ;;  %1953 = vperm.xlu1 %2911, %v1911_v50  }
 0x14e   : > { %2669 = vmatmul.mubr.msk.bf16.gmra.mrb[4].mxu0 %vm896_vm1, %v874_v57  ;;  %1943 = vperm.xlu0 %2910, %v1909_v51  }
 0x14f   : > { %v2640_v60 = vpop.f32.mrb[40].mxu1 }
 0x150   : > { %v776_v61 = vpop.f32.mrb[41].mxu1 }
 0x151   : > { %v2641_v46 = vpop.f32.mrb[42].mxu1 }
 0x152   : > { %v876_v47 = vpack.c.bf16 %v2641_v46, %v2640_v60  ;;  %v779_v48 = vpop.f32.mrb[43].mxu1  ;;  %v1912_v60 = vld [vmem:[%s3777_s3 + $0x18] sm:$0xff] }
 0x153   : > { %v875_v49 = vpack.c.bf16 %v779_v48, %v776_v61  ;;  %v1910_v61 = vld [vmem:[%s3777_s3 + $0x8] sm:$0xff]  ;;  %1958 = vperm.xlu1 %2911, %v1912_v60   ;;  %v1917_v60 = vld [vmem:[%s3777_s3 + $0x40] sm:$0xff] }
 0x154   : > { %1948 = vperm.xlu0 %2910, %v1910_v61   ;;  %v1914_v48 = vld [vmem:[%s3777_s3 + $0x28] sm:$0xff] }
 0x155   : > { %2672 = vmatprep.mubr.msk.bf16.mxu0 %vm896_vm1, %v875_v49  ;;  %v1913_v49 = vld [vmem:[%s3777_s3 + $0x20] sm:$0xff] }
 0x156   : > { %2673 = vmatmul.mubr.msk.bf16.gmra.mrb[8].mxu0 %vm896_vm1, %v876_v47 }
 0x157   : > { %v2644_v54 = vpop.f32.mrb[44].mxu1  ;;  %1968 = vperm.xlu1 %2911, %v1914_v48  }
 0x158   : > { %v792_v53 = vpop.f32.mrb[45].mxu1  ;;  %1963 = vperm.xlu0 %2910, %v1913_v49   ;;  %v1920_v49 = vld [vmem:[%s3777_s3 + $0x58] sm:$0xff] }
 0x159   : > { %v2645_v56 = vpop.f32.mrb[46].mxu1 }
 0x15a   : > { %v878_v57 = vpack.c.bf16 %v2645_v56, %v2644_v54  ;;  %v795_v58 = vpop.f32.mrb[47].mxu1  ;;  %v1915_v56 = vld [vmem:[%s3777_s3 + $0x30] sm:$0xff] }
 0x15b   : > { %v877_v59 = vpack.c.bf16 %v795_v58, %v792_v53  ;;  %1978 = vperm.xlu1 %2911, %v1916_v55   ;;  %v1921_v55 = vld [vmem:[%s3777_s3 + $0x60] sm:$0xff] }
 0x15c   : > { %1973 = vperm.xlu0 %2910, %v1915_v56  }
 0x15d   : > { %2676 = vmatprep.mubr.msk.bf16.mxu0 %vm896_vm1, %v877_v59  ;;  %v1918_v59 = vld [vmem:[%s3777_s3 + $0x48] sm:$0xff] }
 0x15e   : > { %2677 = vmatmul.mubr.msk.bf16.gmra.mrb[12].mxu0 %vm896_vm1, %v878_v57 }
 0x15f   : > { %v2648_v46 = vpop.f32.mrb[48].mxu1  ;;  %1988 = vperm.xlu1 %2911, %v1918_v59  }
 0x160   : > { %v808_v47 = vpop.f32.mrb[49].mxu1  ;;  %1983 = vperm.xlu0 %2910, %v1917_v60   ;;  %v1924_v60 = vld [vmem:[%s3777_s3 + $0x78] sm:$0xff] }
 0x161   : > { %v2649_v54 = vpop.f32.mrb[50].mxu1 }
 0x162   : > { %v880_v50 = vpack.c.bf16 %v2649_v54, %v2648_v46  ;;  %v811_v51 = vpop.f32.mrb[51].mxu1  ;;  %v1919_v54 = vld [vmem:[%s3777_s3 + $0x50] sm:$0xff] }
 0x163   : > { %v879_v53 = vpack.c.bf16 %v811_v51, %v808_v47  ;;  %1998 = vperm.xlu1 %2911, %v1920_v49   ;;  %v1925_v49 = vld [vmem:[%s3777_s3 + $0x80] sm:$0xff] }
 0x164   : > { %1993 = vperm.xlu0 %2910, %v1919_v54  }
 0x165   : > { %2680 = vmatprep.mubr.msk.bf16.mxu0 %vm896_vm1, %v879_v53  ;;  %v1922_v53 = vld [vmem:[%s3777_s3 + $0x68] sm:$0xff] }
 0x166   : > { %2681 = vmatmul.mubr.msk.bf16.gmra.mrb[16].mxu0 %vm896_vm1, %v880_v50 }
 0x167   : > { %v2652_v57 = vpop.f32.mrb[52].mxu1  ;;  %2008 = vperm.xlu1 %2911, %v1922_v53  }
 0x168   : > { %v824_v58 = vpop.f32.mrb[53].mxu1  ;;  %2003 = vperm.xlu0 %2910, %v1921_v55   ;;  %v1928_v55 = vld [vmem:[%s3777_s3 + $0x98] sm:$0xff] }
 0x169   : > { %v2653_v61 = vpop.f32.mrb[54].mxu1 }
 0x16a   : > { %v882_v46 = vpack.c.bf16 %v2653_v61, %v2652_v57  ;;  %v827_v47 = vpop.f32.mrb[55].mxu1  ;;  %v1923_v61 = vld [vmem:[%s3777_s3 + $0x70] sm:$0xff] }
 0x16b   : > { %v881_v48 = vpack.c.bf16 %v827_v47, %v824_v58  ;;  %2018 = vperm.xlu1 %2911, %v1924_v60  }
 0x16c   : > { %2013 = vperm.xlu0 %2910, %v1923_v61   ;;  %v1929_v61 = vld [vmem:[%s3777_s3 + $0xa0] sm:$0xff] }
 0x16d   : > { %2684 = vmatprep.mubr.msk.bf16.mxu0 %vm896_vm1, %v881_v48  ;;  %v1926_v48 = vld [vmem:[%s3777_s3 + $0x88] sm:$0xff] }
 0x16e   : > { %2685 = vmatmul.mubr.msk.bf16.gmra.mrb[20].mxu0 %vm896_vm1, %v882_v46 }
 0x16f   : > { %v2656_v50 = vpop.f32.mrb[56].mxu1  ;;  %2028 = vperm.xlu1 %2911, %v1926_v48  }
 0x170   : > { %v840_v51 = vpop.f32.mrb[57].mxu1  ;;  %2023 = vperm.xlu0 %2910, %v1925_v49  }
 0x171   : > { %v2657_v56 = vpop.f32.mrb[58].mxu1 }
 0x172   : > { %v884_v57 = vpack.c.bf16 %v2657_v56, %v2656_v50  ;;  %v843_v58 = vpop.f32.mrb[59].mxu1  ;;  %v1927_v56 = vld [vmem:[%s3777_s3 + $0x90] sm:$0xff] }
 0x173   : > { %v883_v59 = vpack.c.bf16 %v843_v58, %v840_v51  ;;  %2038 = vperm.xlu1 %2911, %v1928_v55   ;;  %v1938_v55 = vld [vmem:[%s3777_s3 + $0xe8] sm:$0xff] }
 0x174   : > { %2033 = vperm.xlu0 %2910, %v1927_v56  }
 0x175   : > { %2688 = vmatprep.mubr.msk.bf16.mxu0 %vm896_vm1, %v883_v59  ;;  %v1930_v59 = vld [vmem:[%s3777_s3 + $0xa8] sm:$0xff] }
 0x176   : > { %2689 = vmatmul.mubr.msk.bf16.gmra.mrb[24].mxu0 %vm896_vm1, %v884_v57 }
 0x177   : > { %v2660_v46 = vpop.f32.mrb[60].mxu1  ;;  %2048 = vperm.xlu1 %2911, %v1930_v59  }
 0x178   : > { %v856_v47 = vpop.f32.mrb[61].mxu1  ;;  %2043 = vperm.xlu0 %2910, %v1929_v61  }
 0x179   : > { %v2661_v54 = vpop.f32.mrb[62].mxu1 }
 0x17a   : > { %v886_v50 = vpack.c.bf16 %v2661_v54, %v2660_v46  ;;  %v859_v51 = vpop.f32.mrb[63].mxu1  ;;  %v1932_v46 = vld [vmem:[%s3777_s3 + $0xb8] sm:$0xff] }
 0x17b   : > { %v885_v53 = vpack.c.bf16 %v859_v51, %v856_v47  ;;  %v1931_v47 = vld [vmem:[%s3777_s3 + $0xb0] sm:$0xff]  ;;  %2058 = vperm.xlu1 %2911, %v1932_v46  }
 0x17c   : > { %2053 = vperm.xlu0 %2910, %v1931_v47  }
 0x17d   : > { %2692 = vmatprep.mubr.msk.bf16.mxu0 %vm896_vm1, %v885_v53 }
 0x17e   : > { %2693 = vmatmul.mubr.msk.bf16.gmra.mrb[28].mxu0 %vm896_vm1, %v886_v50 }
 0x17f   : > { %2698 = vmatprep.mubr.msk.bf16.mxu0 %vm896_vm1, %v531_v3  ;;  %v3501_v57 = vpop.f32.mrb[64].mxu1  ;;  %2068 = vperm.xlu1 %2911, %v1934_v62  }
 0x180   : > { %v3503_v58 = vpop.f32.mrb[65].mxu1  ;;  %2063 = vperm.xlu0 %2910, %v1933_v0  }
 0x181   : > { %v3508_v60 = vpop.f32.mrb[66].mxu1 }
 0x182   : > { %v1644_v63 = vpack.c.bf16 %v3508_v60, %v3501_v57  ;;  %v3515_v2 = vpop.f32.mrb[67].mxu1 }
 0x183   : > { %v1643_v3 = vpack.c.bf16 %v3515_v2, %v3503_v58 }
 0x186   : > { %2699 = vmatmul.mubr.msk.bf16.vlgmr.msra.gmra.mrb[0].mxu0 %vm896_vm1, %v532_v1 }
 0x187   : > { %2702 = vmatprep.mubr.msk.bf16.mxu0 %vm896_vm1, %v533_v9  ;;  %2771 = vmatpush3.bf16.msra.mxu0 %v3417_v52  ;;  %v3534_v48 = vpop.f32.mrb[68].mxu1  ;;  %v1936_v9 = vld [vmem:[%s3777_s3 + $0xd8] sm:$0xff]  ;;  %v1935_v52 = vld [vmem:[%s3777_s3 + $0xd0] sm:$0xff] }
 0x188   : > { %v3536_v49 = vpop.f32.mrb[69].mxu1  ;;  %2078 = vperm.xlu1 %2911, %v1936_v9   ;;  %2073 = vperm.xlu0 %2910, %v1935_v52  }
 0x189   : > { %v3538_v54 = vpop.f32.mrb[70].mxu1 }
 0x18a   : > { %v1646_v1 = vpack.c.bf16 %v3538_v54, %v3534_v48  ;;  %v3548_v5 = vpop.f32.mrb[71].mxu1 }
 0x18b   : > { %v1645_v8 = vpack.c.bf16 %v3548_v5, %v3536_v49 }
 0x18c   : > { %2088 = vperm.xlu1 %2911, %v1938_v55   ;;  %2083 = vperm.xlu0 %2910, %v1937_v4  }
 0x18e   : > { %2703 = vmatmul.mubr.msk.bf16.gmra.mrb[4].mxu0 %vm896_vm1, %v534_v7 }
 0x18f   : > { %2706 = vmatprep.mubr.msk.bf16.mxu0 %vm896_vm1, %v535_v15  ;;  %v3566_v50 = vpop.f32.mrb[72].mxu1  ;;  %v1939_v15 = vld [vmem:[%s3777_s3 + $0xf0] sm:$0xff] }
 0x190   : > { %v1548_v51 = vpop.f32.mrb[73].mxu1  ;;  %2098 = vperm.xlu1 %2911, %v1940_v14   ;;  %2093 = vperm.xlu0 %2910, %v1939_v15  }
 0x191   : > { %v2749_v53 = vpop.f32.mrb[74].mxu1 }
 0x192   : > { %v1648_v6 = vpack.c.bf16 %v2749_v53, %v3566_v50  ;;  %v1551_v7 = vpop.f32.mrb[75].mxu1 }
 0x193   : > { %v1647_v11 = vpack.c.bf16 %v1551_v7, %v1548_v51 }
 0x196   : > { %2707 = vmatmul.mubr.msk.bf16.gmra.mrb[8].mxu0 %vm896_vm1, %v536_v13 }
 0x197   : > { %2710 = vmatprep.mubr.msk.bf16.mxu0 %vm896_vm1, %v537_v21  ;;  %v2752_v56 = vpop.f32.mrb[76].mxu1 }
 0x198   : > { %v1564_v59 = vpop.f32.mrb[77].mxu1 }
 0x199   : > { %v2753_v61 = vpop.f32.mrb[78].mxu1 }
 0x19a   : > { %v1650_v46 = vpack.c.bf16 %v2753_v61, %v2752_v56  ;;  %v1567_v47 = vpop.f32.mrb[79].mxu1 }
 0x19b   : > { %v1649_v62 = vpack.c.bf16 %v1567_v47, %v1564_v59 }
 0x19e   : > { %2711 = vmatmul.mubr.msk.bf16.gmra.mrb[12].mxu0 %vm896_vm1, %v538_v19 }
 0x19f   : > { %2714 = vmatprep.mubr.msk.bf16.mxu0 %vm896_vm1, %v539_v27  ;;  %v2756_v10 = vpop.f32.mrb[80].mxu1 }
 0x1a0   : > { %v1580_v12 = vpop.f32.mrb[81].mxu1 }
 0x1a1   : > { %v2757_v13 = vpop.f32.mrb[82].mxu1 }
 0x1a2   : > { %v1652_v17 = vpack.c.bf16 %v2757_v13, %v2756_v10  ;;  %v1583_v20 = vpop.f32.mrb[83].mxu1 }
 0x1a3   : > { %v1651_v21 = vpack.c.bf16 %v1583_v20, %v1580_v12 }
 0x1a6   : > { %2715 = vmatmul.mubr.msk.bf16.gmra.mrb[16].mxu0 %vm896_vm1, %v540_v25 }
 0x1a7   : > { %2718 = vmatprep.mubr.msk.bf16.mxu0 %vm896_vm1, %v541_v33  ;;  %v2760_v16 = vpop.f32.mrb[84].mxu1 }
 0x1a8   : > { %v1596_v18 = vpop.f32.mrb[85].mxu1 }
 0x1a9   : > { %v2761_v19 = vpop.f32.mrb[86].mxu1 }
 0x1aa   : > { %v1654_v23 = vpack.c.bf16 %v2761_v19, %v2760_v16  ;;  %v1599_v26 = vpop.f32.mrb[87].mxu1 }
 0x1ab   : > { %v1653_v27 = vpack.c.bf16 %v1599_v26, %v1596_v18 }
 0x1ae   : > { %2719 = vmatmul.mubr.msk.bf16.gmra.mrb[20].mxu0 %vm896_vm1, %v542_v31 }
 0x1af   : > { %2722 = vmatprep.mubr.msk.bf16.mxu0 %vm896_vm1, %v543_v39  ;;  %v2764_v22 = vpop.f32.mrb[88].mxu1 }
 0x1b0   : > { %v1612_v24 = vpop.f32.mrb[89].mxu1 }
 0x1b1   : > { %v2765_v25 = vpop.f32.mrb[90].mxu1 }
 0x1b2   : > { %v1656_v29 = vpack.c.bf16 %v2765_v25, %v2764_v22  ;;  %v1615_v32 = vpop.f32.mrb[91].mxu1 }
 0x1b3   : > { %v1655_v33 = vpack.c.bf16 %v1615_v32, %v1612_v24 }
 0x1b6   : > { %2723 = vmatmul.mubr.msk.bf16.gmra.mrb[24].mxu0 %vm896_vm1, %v544_v37 }
 0x1b7   : > { %2726 = vmatprep.mubr.msk.bf16.mxu0 %vm896_vm1, %v545_v45  ;;  %v2768_v28 = vpop.f32.mrb[92].mxu1 }
 0x1b8   : > { %v1628_v30 = vpop.f32.mrb[93].mxu1 }
 0x1b9   : > { %v2769_v31 = vpop.f32.mrb[94].mxu1 }
 0x1ba   : > { %v1658_v35 = vpack.c.bf16 %v2769_v31, %v2768_v28  ;;  %v1631_v38 = vpop.f32.mrb[95].mxu1 }
 0x1bb   : > { %v1657_v39 = vpack.c.bf16 %v1631_v38, %v1628_v30 }
 0x1be   : > { %2727 = vmatmul.mubr.msk.bf16.gmra.mrb[28].mxu0 %vm896_vm1, %v546_v43 }
 0x1bf   : > { %2772 = vmatprep.mubr.msk.bf16.mxu0 %vm896_vm1, %v1643_v3 }
 0x1c6   : > { %2773 = vmatmul.mubr.msk.bf16.vlgmr.msra.gmra.mrb[0].mxu0 %vm896_vm1, %v1644_v63 }
 0x1c7   : > { %2776 = vmatprep.mubr.msk.bf16.mxu0 %vm896_vm1, %v1645_v8 }
 0x1cc   : > { %v1954_v36 = vpop.permute.xlu1 %1953 }
 0x1cd   : > { %v1944_v34 = vpop.permute.xlu0 %1943 }
 0x1ce   : > { %2777 = vmatmul.mubr.msk.bf16.gmra.mrb[4].mxu0 %vm896_vm1, %v1646_v1 }
 0x1cf   : > { %2780 = vmatprep.mubr.msk.bf16.mxu0 %vm896_vm1, %v1647_v11 }
 0x1d2   : > { %v1959_v40 = vpop.permute.xlu1 %1958 }
 0x1d3   : > { %v1949_v37 = vpop.permute.xlu0 %1948 }
 0x1d6   : > { %2781 = vmatmul.mubr.msk.bf16.gmra.mrb[8].mxu0 %vm896_vm1, %v1648_v6  ;;  %v1969_v42 = vpop.permute.xlu1 %1968 }
 0x1d7   : > { %2784 = vmatprep.mubr.msk.bf16.mxu0 %vm896_vm1, %v1649_v62  ;;  %v1964_v41 = vpop.permute.xlu0 %1963 }
 0x1da   : > { %v1979_v44 = vpop.permute.xlu1 %1978 }
 0x1db   : > { %v1974_v43 = vpop.permute.xlu0 %1973 }
 0x1de   : > { %2785 = vmatmul.mubr.msk.bf16.gmra.mrb[12].mxu0 %vm896_vm1, %v1650_v46  ;;  %v1989_v57 = vpop.permute.xlu1 %1988 }
 0x1df   : > { %2788 = vmatprep.mubr.msk.bf16.mxu0 %vm896_vm1, %v1651_v21  ;;  %v1984_v45 = vpop.permute.xlu0 %1983 }
 0x1e2   : > { %v1999_v60 = vpop.permute.xlu1 %1998 }
 0x1e3   : > { %v1994_v58 = vpop.permute.xlu0 %1993 }
 0x1e6   : > { %2789 = vmatmul.mubr.msk.bf16.gmra.mrb[16].mxu0 %vm896_vm1, %v1652_v17  ;;  %v2009_v5 = vpop.permute.xlu1 %2008 }
 0x1e7   : > { %2792 = vmatprep.mubr.msk.bf16.mxu0 %vm896_vm1, %v1653_v27  ;;  %v2004_v48 = vpop.permute.xlu0 %2003 }
 0x1ea   : > { %v2019_v53 = vpop.permute.xlu1 %2018 }
 0x1eb   : > { %v2014_v9 = vpop.permute.xlu0 %2013 }
 0x1ee   : > { %2793 = vmatmul.mubr.msk.bf16.gmra.mrb[20].mxu0 %vm896_vm1, %v1654_v23  ;;  %v2029_v15 = vpop.permute.xlu1 %2028 }
 0x1ef   : > { %2796 = vmatprep.mubr.msk.bf16.mxu0 %vm896_vm1, %v1655_v33  ;;  %v2024_v14 = vpop.permute.xlu0 %2023 }
 0x1f2   : > { %v2039_v17 = vpop.permute.xlu1 %2038 }
 0x1f3   : > { %v2034_v12 = vpop.permute.xlu0 %2033 }
 0x1f6   : > { %2797 = vmatmul.mubr.msk.bf16.gmra.mrb[24].mxu0 %vm896_vm1, %v1656_v29  ;;  %v2049_v22 = vpop.permute.xlu1 %2048 }
 0x1f7   : > { %2800 = vmatprep.mubr.msk.bf16.mxu0 %vm896_vm1, %v1657_v39  ;;  %v2044_v18 = vpop.permute.xlu0 %2043 }
 0x1fa   : > { %v2059_v28 = vpop.permute.xlu1 %2058 }
 0x1fb   : > { %v2054_v25 = vpop.permute.xlu0 %2053 }
 0x1fe   : > { %2801 = vmatmul.mubr.msk.bf16.gmra.mrb[28].mxu0 %vm896_vm1, %v1658_v35 }
 0x299   : > { %v2774_v63 = vpop.f32.mrb[0].mxu0 }
 0x29a   : > { %v2103_v2 = vadd.f32 %v2774_v63, %v1954_v36  ;;  %v1750_v3 = vpop.f32.mrb[1].mxu0  ;;  %v2069_v36 = vpop.permute.xlu1 %2068 }
 0x29b   : > { %v2101_v49 = vadd.f32 %v1944_v34, %v1750_v3  ;;  %v2775_v54 = vpop.f32.mrb[2].mxu0  ;;  %v2064_v34 = vpop.permute.xlu0 %2063 }
 0x29c   : > { %2136 = vst.msk [vmem:[%s3656_s30 + $0x10] sm:$0xff] %vm2133_vm2, %v2103_v2  ;;  %v2104_v0 = vadd.f32 %v2775_v54, %v1959_v40  ;;  %v1753_v1 = vpop.f32.mrb[3].mxu0 }
 0x29d   : > { %2134 = vst.msk [vmem:[%s3656_s30] sm:$0xff] %vm2133_vm2, %v2101_v49  ;;  %v2102_v8 = vadd.f32 %v1949_v37, %v1753_v1 }
 0x29e   : > { %2137 = vst.msk [vmem:[%s3656_s30 + $0x18] sm:$0xff] %vm2133_vm2, %v2104_v0 }
 0x29f   : > { %2135 = vst.msk [vmem:[%s3656_s30 + $0x8] sm:$0xff] %vm2133_vm2, %v2102_v8 }
 0x2a1   : > { %v2778_v52 = vpop.f32.mrb[4].mxu0 }
 0x2a2   : > { %v2107_v50 = vadd.f32 %v2778_v52, %v1974_v43  ;;  %v1766_v51 = vpop.f32.mrb[5].mxu0 }
 0x2a3   : > { %v2105_v55 = vadd.f32 %v1964_v41, %v1766_v51  ;;  %v2779_v4 = vpop.f32.mrb[6].mxu0 }
 0x2a4   : > { %2140 = vst.msk [vmem:[%s3656_s30 + $0x30] sm:$0xff] %vm2133_vm2, %v2107_v50  ;;  %v2108_v6 = vadd.f32 %v2779_v4, %v1979_v44  ;;  %v1769_v7 = vpop.f32.mrb[7].mxu0 }
 0x2a5   : > { %2138 = vst.msk [vmem:[%s3656_s30 + $0x20] sm:$0xff] %vm2133_vm2, %v2105_v55  ;;  %v2106_v11 = vadd.f32 %v1969_v42, %v1769_v7 }
 0x2a6   : > { %2141 = vst.msk [vmem:[%s3656_s30 + $0x38] sm:$0xff] %vm2133_vm2, %v2108_v6 }
 0x2a7   : > { %2139 = vst.msk [vmem:[%s3656_s30 + $0x28] sm:$0xff] %vm2133_vm2, %v2106_v11 }
 0x2a9   : > { %v2782_v56 = vpop.f32.mrb[8].mxu0 }
 0x2aa   : > { %v2111_v59 = vadd.f32 %v2782_v56, %v1994_v58  ;;  %v1782_v61 = vpop.f32.mrb[9].mxu0 }
 0x2ab   : > { %v2109_v46 = vadd.f32 %v1984_v45, %v1782_v61  ;;  %v2783_v47 = vpop.f32.mrb[10].mxu0 }
 0x2ac   : > { %2144 = vst.msk [vmem:[%s3656_s30 + $0x50] sm:$0xff] %vm2133_vm2, %v2111_v59  ;;  %v2112_v62 = vadd.f32 %v2783_v47, %v1999_v60  ;;  %v1785_v10 = vpop.f32.mrb[11].mxu0  ;;  %v2079_v60 = vpop.permute.xlu1 %2078 }
 0x2ad   : > { %2142 = vst.msk [vmem:[%s3656_s30 + $0x40] sm:$0xff] %vm2133_vm2, %v2109_v46  ;;  %v2110_v13 = vadd.f32 %v1989_v57, %v1785_v10  ;;  %v2074_v57 = vpop.permute.xlu0 %2073 }
 0x2ae   : > { %2145 = vst.msk [vmem:[%s3656_s30 + $0x58] sm:$0xff] %vm2133_vm2, %v2112_v62 }
 0x2af   : > { %2143 = vst.msk [vmem:[%s3656_s30 + $0x48] sm:$0xff] %vm2133_vm2, %v2110_v13 }
 0x2b1   : > { %v2786_v20 = vpop.f32.mrb[12].mxu0 }
 0x2b2   : > { %v2115_v21 = vadd.f32 %v2786_v20, %v2014_v9  ;;  %v1798_v16 = vpop.f32.mrb[13].mxu0 }
 0x2b3   : > { %v2113_v19 = vadd.f32 %v2004_v48, %v1798_v16  ;;  %v2787_v23 = vpop.f32.mrb[14].mxu0  ;;  %v2084_v48 = vpop.permute.xlu0 %2083 }
 0x2b4   : > { %2148 = vst.msk [vmem:[%s3656_s30 + $0x70] sm:$0xff] %vm2133_vm2, %v2115_v21  ;;  %v2116_v26 = vadd.f32 %v2787_v23, %v2019_v53  ;;  %v1801_v27 = vpop.f32.mrb[15].mxu0 }
 0x2b5   : > { %2146 = vst.msk [vmem:[%s3656_s30 + $0x60] sm:$0xff] %vm2133_vm2, %v2113_v19  ;;  %v2114_v24 = vadd.f32 %v2009_v5, %v1801_v27  ;;  %v2089_v5 = vpop.permute.xlu1 %2088 }
 0x2b6   : > { %2149 = vst.msk [vmem:[%s3656_s30 + $0x78] sm:$0xff] %vm2133_vm2, %v2116_v26 }
 0x2b7   : > { %2147 = vst.msk [vmem:[%s3656_s30 + $0x68] sm:$0xff] %vm2133_vm2, %v2114_v24  ;;  %v2094_v9 = vpop.permute.xlu0 %2093 }
 0x2b9   : > { %v2790_v29 = vpop.f32.mrb[16].mxu0  ;;  %v2099_v53 = vpop.permute.xlu1 %2098 }
 0x2ba   : > { %v2119_v32 = vadd.f32 %v2790_v29, %v2034_v12  ;;  %v1814_v33 = vpop.f32.mrb[17].mxu0 }
 0x2bb   : > { %v2117_v30 = vadd.f32 %v2024_v14, %v1814_v33  ;;  %v2791_v31 = vpop.f32.mrb[18].mxu0 }
 0x2bc   : > { %2152 = vst.msk [vmem:[%s3656_s30 + $0x90] sm:$0xff] %vm2133_vm2, %v2119_v32  ;;  %v2120_v35 = vadd.f32 %v2791_v31, %v2039_v17  ;;  %v1817_v38 = vpop.f32.mrb[19].mxu0 }
 0x2bd   : > { %2150 = vst.msk [vmem:[%s3656_s30 + $0x80] sm:$0xff] %vm2133_vm2, %v2117_v30  ;;  %v2118_v39 = vadd.f32 %v2029_v15, %v1817_v38 }
 0x2be   : > { %2153 = vst.msk [vmem:[%s3656_s30 + $0x98] sm:$0xff] %vm2133_vm2, %v2120_v35 }
 0x2bf   : > { %2151 = vst.msk [vmem:[%s3656_s30 + $0x88] sm:$0xff] %vm2133_vm2, %v2118_v39 }
 0x2c1   : > { %v2794_v37 = vpop.f32.mrb[20].mxu0 }
 0x2c2   : > { %v2123_v40 = vadd.f32 %v2794_v37, %v2054_v25  ;;  %v1830_v41 = vpop.f32.mrb[21].mxu0 }
 0x2c3   : > { %v2121_v42 = vadd.f32 %v2044_v18, %v1830_v41  ;;  %v2795_v43 = vpop.f32.mrb[22].mxu0 }
 0x2c4   : > { %2156 = vst.msk [vmem:[%s3656_s30 + $0xb0] sm:$0xff] %vm2133_vm2, %v2123_v40  ;;  %v2124_v44 = vadd.f32 %v2795_v43, %v2059_v28  ;;  %v1833_v45 = vpop.f32.mrb[23].mxu0 }
 0x2c5   : > { %2154 = vst.msk [vmem:[%s3656_s30 + $0xa0] sm:$0xff] %vm2133_vm2, %v2121_v42  ;;  %v2122_v58 = vadd.f32 %v2049_v22, %v1833_v45 }
 0x2c6   : > { %2157 = vst.msk [vmem:[%s3656_s30 + $0xb8] sm:$0xff] %vm2133_vm2, %v2124_v44 }
 0x2c7   : > { %2155 = vst.msk [vmem:[%s3656_s30 + $0xa8] sm:$0xff] %vm2133_vm2, %v2122_v58 }
 0x2c9   : > { %v2798_v63 = vpop.f32.mrb[24].mxu0 }
 0x2ca   : > { %v2127_v2 = vadd.f32 %v2798_v63, %v2074_v57  ;;  %v1846_v3 = vpop.f32.mrb[25].mxu0 }
 0x2cb   : > { %v2125_v49 = vadd.f32 %v2064_v34, %v1846_v3  ;;  %v2799_v54 = vpop.f32.mrb[26].mxu0 }
 0x2cc   : > { %2160 = vst.msk [vmem:[%s3656_s30 + $0xd0] sm:$0xff] %vm2133_vm2, %v2127_v2  ;;  %v2128_v0 = vadd.f32 %v2799_v54, %v2079_v60  ;;  %v1849_v1 = vpop.f32.mrb[27].mxu0 }
 0x2cd   : > { %2158 = vst.msk [vmem:[%s3656_s30 + $0xc0] sm:$0xff] %vm2133_vm2, %v2125_v49  ;;  %v2126_v8 = vadd.f32 %v2069_v36, %v1849_v1 }
 0x2ce   : > { %2161 = vst.msk [vmem:[%s3656_s30 + $0xd8] sm:$0xff] %vm2133_vm2, %v2128_v0 }
 0x2cf   : > { %2159 = vst.msk [vmem:[%s3656_s30 + $0xc8] sm:$0xff] %vm2133_vm2, %v2126_v8 }
 0x2d1   : > { %v2802_v52 = vpop.f32.mrb[28].mxu0 }
 0x2d2   : > { %v2131_v50 = vadd.f32 %v2802_v52, %v2094_v9  ;;  %v1862_v51 = vpop.f32.mrb[29].mxu0 }
 0x2d3   : > { %v2129_v55 = vadd.f32 %v2084_v48, %v1862_v51  ;;  %v2803_v4 = vpop.f32.mrb[30].mxu0 }
 0x2d4   : > { %2164 = vst.msk [vmem:[%s3656_s30 + $0xf0] sm:$0xff] %vm2133_vm2, %v2131_v50  ;;  %v2132_v6 = vadd.f32 %v2803_v4, %v2099_v53  ;;  %v1865_v7 = vpop.f32.mrb[31].mxu0 }
 0x2d5   : > { %2162 = vst.msk [vmem:[%s3656_s30 + $0xe0] sm:$0xff] %vm2133_vm2, %v2129_v55  ;;  %v2130_v11 = vadd.f32 %v2089_v5, %v1865_v7 }
 0x2d6   : > { %2165 = vst.msk [vmem:[%s3656_s30 + $0xf8] sm:$0xff] %vm2133_vm2, %v2132_v6 }
 0x2d7   : > { %2163 = vst.msk [vmem:[%s3656_s30 + $0xe8] sm:$0xff] %vm2133_vm2, %v2130_v11 }
 0x2d8   : > { %2976 = shalt.err (!%p2973_p3)
}
 0x2d9   : > { %s2977_s14 = scalar_lea.hbm %s3721_s9, 4096  ;;  %s2981_s23 = scalar_lea.hbm %s3778_s4, 8192 }
 0x2da   : > { %p2978_p4 = scmp.ne.s32.totalorder %s3721_s9, %s2977_s14  ;;  %p2982_p9 = scmp.lt.u32.totalorder %s3721_s9, %s3778_s4 }
 0x2db   : > { %p2983_p10 = scmp.lt.u32.totalorder %s2981_s23, %s2977_s14  ;;  %p2985_p12 = scmp.lt.u32.totalorder %s2977_s14, %s3721_s9 }
 0x2dc   : > { %p2979_p7 = pnand %p2978_p4, %p3094_p5 }
 0x2dd   : > { %p2984_p11 = por %p2983_p10, %p2982_p9 }
 0x2de   : > { %p2980_p8 = pneg %p2979_p7 }
 0x2df   : > { %p2986_p13 = por %p2985_p12, %p2984_p11 }
 0x2e1   : > { %p2987_p0 = pnand %p2986_p13, %p2980_p8 }
 0x2e3   : > { %2990 = shalt.err (!%p2987_p0)
}
 0x2e4   : > { %s3029_s29 = smov 128   ;;  %s3030_s30 = smov 8  }
 0x2e5   : > { %2868 = dma.vmem_to_hbm [thread:$0]  (%p3094_p5), %s3723_s6, 4096, %s3721_s9, %s3733_s19, %s3029_s29, %s3029_s29, %s3030_s30  }
 0x2e6 PF: > { %p2874_p1 = scmp.ge.s32.totalorder %s3025_s18, 2  ;;  %s2195_s5 = sand.u32 1, %s3013_s15  }
 0x2e7   : > { %s2196_s7 = scalar_lea.sflag [#allocation3], %s2195_s5 }
 0x2e8   : > { %p2871_p2 = pnand %p2874_p1, %p3098_p6 }
 0x2ea   : > { %3008 = dma.done.wait (!%p2871_p2), %s2196_s7, 4096  }
 0x2eb   : > { %3010 = vsyncadd (!%p2871_p2), %s2196_s7, 4294963200  ;;  %p14_p3 = scmp.ge.s32.totalorder %s3081_s21, 4   ;;  %s3781_s15 = smov %s3017_s16 }
 0x2ec   : > { %s3782_s16 = smov %s3021_s17  ;;  %s3783_s17 = smov %s3092_s24 }
 0x2ed   : > { %s3784_s18 = smov %s3081_s21  ;;  %16 = sbr.rel (!%p14_p3) target bundleno = 3 (0x3), region = 75 }
 0x2f4   :  { %2201 = vsyncpa [#allocation3], 1 }
 0x2f5   :  { %2203 = vsyncpa [#allocation3 + $0x1], 1 }

</bundles_post_ra>
